<compile_context>
chip_gen: v7x
topology: tpu7x:2x2x1
jax: 0.10.0
libtpu: 0.0.40
codegen_flags: <defaults>
</compile_context>

<pallas_src>
import functools

import jax
import jax.numpy as jnp
import numpy as np
from jax import lax
from jax.experimental import pallas as pl
from jax.experimental.pallas import tpu as pltpu


def _round_up(x, m):
    return ((x + m - 1) // m) * m


def _npairs_kernel(x_ref, tgt_row_ref, prt_row_ref, tgt_col_ref, prt_col_ref,
                   out_ref, *, n_valid, has_pad):
    i = pl.program_id(0)
    tm = tgt_col_ref.shape[0]
    n_pad = x_ref.shape[0]
    neg_big = jnp.float32(-1e30)

    # LHS row tile sliced from the single VMEM-resident copy of x (x is DMA'd
    # from HBM exactly once).  Contraction over the trailing feature dim of
    # both operands is the q @ k.T pattern Mosaic handles natively on the MXU.
    row_start = pl.multiple_of(i * tm, tm)
    lhs = x_ref[pl.ds(row_start, tm), :]                  # (tm, d)
    prod = lax.dot_general(
        lhs, x_ref[...],
        dimension_numbers=(((1,), (1,)), ((), ())),
        preferred_element_type=jnp.float32,
    )                                                     # (tm, n_pad) f32

    if has_pad:
        # Padded tail columns: push their similarity to -1e30 so one broadcast
        # add removes them from every exp() sum (cheaper than carrying
        # explicit column-validity masks through the selects).
        col_valid = lax.broadcasted_iota(jnp.int32, (1, n_pad), 1) < n_valid
        prod = prod + jnp.where(col_valid, jnp.float32(0.0), neg_big)

    tgt_row = tgt_row_ref[...]                            # (1, n_pad) int32
    prt_row = prt_row_ref[...]                            # (1, n_pad) int32
    tgt_col = tgt_col_ref[...]                            # (tm, 1)    int32
    prt_col = prt_col_ref[...]                            # (tm, 1)    int32

    same_class = tgt_col == tgt_row                       # (tm, n_pad)
    same_atten = prt_col == prt_row
    sasc = jnp.logical_and(same_class, same_atten)        # anchors paired with S1
    pos_any = jnp.logical_or(same_class, same_atten)      # ~dadc = every positive pair

    # Log-sum-exp stabilized row sums of exp(prod) over the two negative sets
    # (negatives of sasc anchors = ~sasc; negatives of sadc/dasc anchors =
    # dadc = ~pos_any); a single exp pass feeds both masked reductions.
    m = jnp.max(jnp.where(sasc, neg_big, prod), axis=1, keepdims=True)
    # Floor m only when the negative set is empty / all-padded; clamping it up
    # to 0 unconditionally (previous revision) could underflow every negative
    # and silently drop positive-pair terms.
    m = jnp.maximum(m, jnp.float32(-1e15))
    e = jnp.exp(prod - m)
    s1 = jnp.sum(jnp.where(sasc, 0.0, e), axis=1, keepdims=True)      # (tm, 1)
    s2 = jnp.sum(jnp.where(pos_any, 0.0, e), axis=1, keepdims=True)   # (tm, 1)
    log_s1 = m + jnp.log(s1)            # -inf when that negative set is empty
    log_s2 = m + jnp.log(s2)

    # Fused positive pass: log(1 + exp(-prod) * S) = softplus(log S - prod);
    # sasc anchors use S1, sadc/dasc anchors use S2, dadc pairs contribute 0.
    z = jnp.where(sasc, log_s1, log_s2) - prod
    softplus = jnp.maximum(z, 0.0) + jnp.log1p(jnp.exp(-jnp.abs(z)))
    pos_contrib = jnp.sum(jnp.where(pos_any, softplus, 0.0),
                          axis=1, keepdims=True)          # (tm, 1)

    if has_pad:
        # Padded tail rows: zero their (tm, 1) partial sums instead of AND-ing
        # a full-panel validity mask.
        row_valid = (row_start
                     + lax.broadcasted_iota(jnp.int32, (tm, 1), 0)) < n_valid
        pos_contrib = jnp.where(row_valid, pos_contrib, 0.0)

    # Per-tile partial loss broadcast to a lane-dense (1, 8, 128) block (one
    # unmasked vst); the wrapper reduces across tiles.  Tiles are independent,
    # so the grid axis is "parallel" (both v7x TensorCores get work).
    tile_loss = jnp.sum(pos_contrib)
    out_ref[...] = jnp.broadcast_to(tile_loss, (1, 8, 128))


def _pick_row_tile(n, d, itemsize, vmem_limit):
    """Largest TM whose resident x + live panels fit comfortably in VMEM."""
    budget = int(vmem_limit * 0.7)
    for tm in (128, 64, 32, 16, 8):
        n_pad = _round_up(n, tm)
        resident = 2 * n_pad * d * itemsize            # x (worst case: 2 buffers)
        ids = 2 * 8 * n_pad * 4 + 4 * tm * 128 * 4     # id row vectors + (tm,1) cols
        temps = 10 * tm * n_pad * 4                    # prod/e/masks/softplus panels
        if resident + ids + temps <= budget:
            return tm
    # TODO(synk): column tiling (flash-style 2-pass) once even TM=8 panels plus
    # the resident x no longer fit; required to scale n_pad past ~8-16K on v7x.
    return 8


def npairs_loss(inputs, targets, *, row_tile=None, cast_matmul_to_bf16=False):
    """inputs: (b, p, d) float, targets: (b,) int. Returns scalar float32."""
    b, p, d = inputs.shape
    n = b * p
    x = inputs.reshape(n, d)                       # keep the caller's dtype
    if cast_matmul_to_bf16 and x.dtype == jnp.float32:
        # Optional (v5e / VMEM-tight): halves resident x + HBM bytes; matmul
        # accumulates in f32 but similarities are bf16-rounded.
        x = x.astype(jnp.bfloat16)

    targets_rep = jnp.repeat(targets.astype(jnp.int32), p)        # (n,)
    parts = jnp.tile(jnp.arange(p, dtype=jnp.int32), b)           # (n,)

    # Generation-aware VMEM budget: ~7/8 of per-core capacity
    # (≈56 MiB on v7x, ≈112 MiB on v5e/v6e).
    try:
        vmem_cap = int(pltpu.get_tpu_info().vmem_capacity_bytes)
    except Exception:
        vmem_cap = 64 * 1024 * 1024        # v7x per-core size: safe everywhere
    vmem_limit = (vmem_cap * 7) // 8

    itemsize = jnp.dtype(x.dtype).itemsize
    if row_tile is None:
        row_tile = _pick_row_tile(n, d, itemsize, vmem_limit)

    # Row tile: multiple of 8 sublanes; n padded to a whole number of tiles.
    if n <= row_tile:
        tm = _round_up(max(n, 8), 8)
        n_pad = tm
    else:
        tm = row_tile
        n_pad = _round_up(n, tm)

    pad = n_pad - n
    if pad:
        x = jnp.pad(x, ((0, pad), (0, 0)))
        targets_rep = jnp.pad(targets_rep, (0, pad), constant_values=-1)
        parts = jnp.pad(parts, (0, pad), constant_values=-1)

    tgt_row = targets_rep.reshape(1, n_pad)
    prt_row = parts.reshape(1, n_pad)
    tgt_col = targets_rep.reshape(n_pad, 1)
    prt_col = parts.reshape(n_pad, 1)

    num_tiles = n_pad // tm
    kernel = functools.partial(_npairs_kernel, n_valid=n, has_pad=pad > 0)

    def call(single_buffer_invariant):
        inv_kw = ({"pipeline_mode": pl.Buffered(1)}
                  if single_buffer_invariant else {})
        in_specs = [
            pl.BlockSpec((n_pad, d), lambda i: (0, 0), **inv_kw),  # x, VMEM-resident
            pl.BlockSpec((1, n_pad), lambda i: (0, 0), **inv_kw),  # class ids (row)
            pl.BlockSpec((1, n_pad), lambda i: (0, 0), **inv_kw),  # part ids (row)
            pl.BlockSpec((tm, 1), lambda i: (i, 0)),               # class ids, tile
            pl.BlockSpec((tm, 1), lambda i: (i, 0)),               # part ids, tile
        ]
        return pl.pallas_call(
            kernel,
            out_shape=jax.ShapeDtypeStruct((num_tiles, 8, 128), jnp.float32),
            grid=(num_tiles,),
            in_specs=in_specs,
            out_specs=pl.BlockSpec((1, 8, 128), lambda i: (i, 0, 0)),
            compiler_params=pltpu.CompilerParams(
                dimension_semantics=("parallel",),   # independent per-tile partials
                vmem_limit_bytes=int(vmem_limit),
            ),
        )(x, tgt_row, prt_row, tgt_col, prt_col)

    try:
        partials = call(True)       # single-buffered grid-invariant blocks
    except Exception:
        partials = call(False)      # fallback: default double buffering

    return jnp.sum(partials[:, 0, 0]) / jnp.float32(n)


def npairs_loss_ref(inputs, targets):
    """Direct numpy port of the PyTorch reference (per-row loop), for checking."""
    inputs = np.asarray(inputs, dtype=np.float64)
    targets = np.asarray(targets)
    b, p, d = inputs.shape
    n = b * p
    x = inputs.reshape(n, d)
    t = np.repeat(targets, p)
    parts = np.tile(np.arange(p), b)
    prod = x @ x.T
    same_class = t[:, None] == t[None, :]
    same_atten = parts[:, None] == parts[None, :]
    sasc = same_class & same_atten
    sadc = ~same_class & same_atten
    dasc = same_class & ~same_atten
    dadc = ~same_class & ~same_atten
    loss = 0.0
    for i in range(n):
        for pos_m, neg_m in ((sasc[i], sadc[i] | dasc[i] | dadc[i]),
                             (sadc[i], dadc[i]),
                             (dasc[i], dadc[i])):
            pos = prod[i][pos_m]
            neg = prod[i][neg_m]
            if pos.size and neg.size:
                loss += np.sum(
                    np.log(1.0 + np.sum(np.exp(neg[None, :] - pos[:, None]), axis=1)))
    return loss / n


if __name__ == "__main__":
    key = jax.random.PRNGKey(0)

    # Case 1: module layout (batch, part_num, feat_dim), single tile, no padding.
    k_x, k_t, key = jax.random.split(key, 3)
    b, p, d = 2, 4, 32            # -> n = 8 anchors
    inputs = 0.1 * jax.random.normal(k_x, (b, p, d), dtype=jnp.float32)
    targets = jax.random.randint(k_t, (b,), 0, 3, dtype=jnp.int32)
    loss = jax.block_until_ready(npairs_loss(inputs, targets))
    ref = npairs_loss_ref(np.asarray(inputs), np.asarray(targets))
    assert np.isfinite(float(loss))
    assert abs(float(loss) - float(ref)) < 1e-3, (float(loss), float(ref))

    # Case 2: multi-tile parallel grid + tail padding (n = 15, TM = 8, n_pad = 16).
    k_x2, k_t2, key = jax.random.split(key, 3)
    b2, p2, d2 = 3, 5, 48
    inputs2 = 0.1 * jax.random.normal(k_x2, (b2, p2, d2), dtype=jnp.float32)
    targets2 = jax.random.randint(k_t2, (b2,), 0, 4, dtype=jnp.int32)
    loss2 = jax.block_until_ready(npairs_loss(inputs2, targets2, row_tile=8))
    ref2 = npairs_loss_ref(np.asarray(inputs2), np.asarray(targets2))
    assert np.isfinite(float(loss2))
    assert abs(float(loss2) - float(ref2)) < 1e-3, (float(loss2), float(ref2))

    # Case 3: degenerate case (all anchors same class, p = 1 -> every negative
    # set empty) exercising the padded-column bias + LSE floor path; loss = 0.
    k_x3, key = jax.random.split(key, 2)
    inputs3 = 0.1 * jax.random.normal(k_x3, (2, 1, 32), dtype=jnp.float32)
    targets3 = jnp.array([3, 3], dtype=jnp.int32)
    loss3 = jax.block_until_ready(npairs_loss(inputs3, targets3))
    ref3 = npairs_loss_ref(np.asarray(inputs3), np.asarray(targets3))
    assert np.isfinite(float(loss3))
    assert abs(float(loss3) - float(ref3)) < 1e-5, (float(loss3), float(ref3))

    print("KERNEL_OK")
</pallas_src>

<mosaic_0001>
module attributes {stable_mosaic.version = 11 : i64} {
  func.func @_npairs_kernel(%arg0: i32, %arg1: memref<8x32xf32, #tpu.memory_space<vmem>>, %arg2: memref<1x8xi32, #tpu.memory_space<vmem>>, %arg3: memref<1x8xi32, #tpu.memory_space<vmem>>, %arg4: memref<8x1xi32, #tpu.memory_space<vmem>>, %arg5: memref<8x1xi32, #tpu.memory_space<vmem>>, %arg6: memref<1x8x128xf32, #tpu.memory_space<vmem>>) attributes {dimension_semantics = [#tpu.dimension_semantics<parallel>], iteration_bounds = array<i64: 1>, scalar_prefetch = 0 : i64, scratch_operands = 0 : i64, tpu.core_type = #tpu.core_type<tc>, window_params = [{pipeline_mode = #tpu.pipeline_mode<synchronous>, transform_indices = @transform_0, window_bounds = array<i64: 8, 32>}, {pipeline_mode = #tpu.pipeline_mode<synchronous>, transform_indices = @transform_1, window_bounds = array<i64: 1, 8>}, {pipeline_mode = #tpu.pipeline_mode<synchronous>, transform_indices = @transform_2, window_bounds = array<i64: 1, 8>}, {transform_indices = @transform_3, window_bounds = array<i64: 8, 1>}, {transform_indices = @transform_4, window_bounds = array<i64: 8, 1>}, {transform_indices = @transform_5, window_bounds = array<i64: 1, 8, 128>}]} {
    %c8_i32 = arith.constant 8 : i32
    %0 = arith.muli %arg0, %c8_i32 : i32
    %1 = tpu.assume_multiple %0, 8 : i32
    %2 = arith.index_cast %1 : i32 to index
    %c0 = arith.constant 0 : index
    %3 = vector.load %arg1[%2, %c0] : memref<8x32xf32, #tpu.memory_space<vmem>>, vector<8x32xf32>
    %c0_0 = arith.constant 0 : index
    %c0_1 = arith.constant 0 : index
    %4 = vector.load %arg1[%c0_0, %c0_1] : memref<8x32xf32, #tpu.memory_space<vmem>>, vector<8x32xf32>
    %cst = arith.constant dense<0.000000e+00> : vector<8x8xf32>
    %5 = tpu.matmul %3, %4, %cst {dimension_numbers = #tpu.dot_dimension_numbers<[1], [1], [0], [0], [0, 0, 1, 0], [], []>} : vector<8x32xf32>, vector<8x32xf32>, vector<8x8xf32> -> vector<8x8xf32>
    %c0_2 = arith.constant 0 : index
    %c0_3 = arith.constant 0 : index
    %6 = vector.load %arg2[%c0_2, %c0_3] : memref<1x8xi32, #tpu.memory_space<vmem>>, vector<1x8xi32>
    %c0_4 = arith.constant 0 : index
    %c0_5 = arith.constant 0 : index
    %7 = vector.load %arg3[%c0_4, %c0_5] : memref<1x8xi32, #tpu.memory_space<vmem>>, vector<1x8xi32>
    %c0_6 = arith.constant 0 : index
    %c0_7 = arith.constant 0 : index
    %8 = vector.load %arg4[%c0_6, %c0_7] : memref<8x1xi32, #tpu.memory_space<vmem>>, vector<8x1xi32>
    %c0_8 = arith.constant 0 : index
    %c0_9 = arith.constant 0 : index
    %9 = vector.load %arg5[%c0_8, %c0_9] : memref<8x1xi32, #tpu.memory_space<vmem>>, vector<8x1xi32>
    %10 = vector.broadcast %8 : vector<8x1xi32> to vector<8x8xi32>
    %11 = vector.broadcast %6 : vector<1x8xi32> to vector<8x8xi32>
    %12 = arith.cmpi eq, %10, %11 : vector<8x8xi32>
    %13 = vector.broadcast %9 : vector<8x1xi32> to vector<8x8xi32>
    %14 = vector.broadcast %7 : vector<1x8xi32> to vector<8x8xi32>
    %15 = arith.cmpi eq, %13, %14 : vector<8x8xi32>
    %16 = arith.andi %12, %15 : vector<8x8xi1>
    %17 = arith.ori %12, %15 : vector<8x8xi1>
    %cst_10 = arith.constant -1.000000e+30 : f32
    %18 = vector.broadcast %cst_10 : f32 to vector<8x8xf32>
    %19 = arith.select %16, %18, %5 : vector<8x8xi1>, vector<8x8xf32>
    %cst_11 = arith.constant dense<0xFF800000> : vector<8xf32>
    %20 = vector.multi_reduction <maximumf>, %19, %cst_11 [1] : vector<8x8xf32> to vector<8xf32>
    %21 = vector.shape_cast %20 : vector<8xf32> to vector<8x1xf32>
    %cst_12 = arith.constant -9.99999986E+14 : f32
    %22 = vector.broadcast %cst_12 : f32 to vector<8x1xf32>
    %23 = arith.maximumf %21, %22 : vector<8x1xf32>
    %24 = vector.broadcast %23 : vector<8x1xf32> to vector<8x8xf32>
    %25 = arith.subf %5, %24 : vector<8x8xf32>
    %26 = math.exp %25 : vector<8x8xf32>
    %cst_13 = arith.constant 0.000000e+00 : f32
    %27 = vector.broadcast %cst_13 : f32 to vector<8x8xf32>
    %28 = arith.select %16, %27, %26 : vector<8x8xi1>, vector<8x8xf32>
    %cst_14 = arith.constant dense<0.000000e+00> : vector<8xf32>
    %29 = vector.multi_reduction <add>, %28, %cst_14 [1] : vector<8x8xf32> to vector<8xf32>
    %30 = vector.shape_cast %29 : vector<8xf32> to vector<8x1xf32>
    %cst_15 = arith.constant 0.000000e+00 : f32
    %31 = vector.broadcast %cst_15 : f32 to vector<8x8xf32>
    %32 = arith.select %17, %31, %26 : vector<8x8xi1>, vector<8x8xf32>
    %cst_16 = arith.constant dense<0.000000e+00> : vector<8xf32>
    %33 = vector.multi_reduction <add>, %32, %cst_16 [1] : vector<8x8xf32> to vector<8xf32>
    %34 = vector.shape_cast %33 : vector<8xf32> to vector<8x1xf32>
    %35 = math.log %30 : vector<8x1xf32>
    %36 = arith.addf %23, %35 : vector<8x1xf32>
    %37 = math.log %34 : vector<8x1xf32>
    %38 = arith.addf %23, %37 : vector<8x1xf32>
    %39 = vector.shape_cast %36 : vector<8x1xf32> to vector<8x1xf32>
    %40 = vector.broadcast %39 : vector<8x1xf32> to vector<8x8xf32>
    %41 = vector.shape_cast %38 : vector<8x1xf32> to vector<8x1xf32>
    %42 = vector.broadcast %41 : vector<8x1xf32> to vector<8x8xf32>
    %43 = arith.select %16, %40, %42 : vector<8x8xi1>, vector<8x8xf32>
    %44 = arith.subf %43, %5 : vector<8x8xf32>
    %cst_17 = arith.constant 0.000000e+00 : f32
    %45 = vector.broadcast %cst_17 : f32 to vector<8x8xf32>
    %46 = arith.maximumf %44, %45 : vector<8x8xf32>
    %47 = math.absf %44 : vector<8x8xf32>
    %cst_18 = arith.constant 0.000000e+00 : f32
    %48 = vector.broadcast %cst_18 : f32 to vector<8x8xf32>
    %49 = arith.subf %48, %47 : vector<8x8xf32>
    %50 = math.exp %49 : vector<8x8xf32>
    %51 = math.log1p %50 : vector<8x8xf32>
    %52 = arith.addf %46, %51 : vector<8x8xf32>
    %cst_19 = arith.constant 0.000000e+00 : f32
    %53 = vector.broadcast %cst_19 : f32 to vector<8x8xf32>
    %54 = arith.select %17, %52, %53 : vector<8x8xi1>, vector<8x8xf32>
    %cst_20 = arith.constant dense<0.000000e+00> : vector<8xf32>
    %55 = vector.multi_reduction <add>, %54, %cst_20 [1] : vector<8x8xf32> to vector<8xf32>
    %56 = vector.shape_cast %55 : vector<8xf32> to vector<8x1xf32>
    %57 = vector.shape_cast %56 : vector<8x1xf32> to vector<1x8x1xf32>
    %cst_21 = arith.constant dense<0.000000e+00> : vector<1xf32>
    %58 = vector.multi_reduction <add>, %57, %cst_21 [1, 2] : vector<1x8x1xf32> to vector<1xf32>
    %59 = vector.shape_cast %58 : vector<1xf32> to vector<1x1x1xf32>
    %60 = vector.extract %59[0, 0, 0] : f32 from vector<1x1x1xf32>
    %61 = vector.broadcast %60 : f32 to vector<1x8x128xf32>
    %c0_22 = arith.constant 0 : index
    %c0_23 = arith.constant 0 : index
    %c0_24 = arith.constant 0 : index
    %62 = vector.load %arg6[%c0_22, %c0_23, %c0_24] : memref<1x8x128xf32, #tpu.memory_space<vmem>>, vector<1x8x128xf32>
    tpu.vector_store %arg6[%c0_22, %c0_23, %c0_24], %61 {strides = array<i32>} : memref<1x8x128xf32, #tpu.memory_space<vmem>>, vector<1x8x128xf32>,
    return
  }
  func.func @transform_0(%arg0: i32) -> (i32, i32) {
    %c0_i32 = arith.constant 0 : i32
    %c0_i32_0 = arith.constant 0 : i32
    %c0_i32_1 = arith.constant 0 : i32
    return %c0_i32, %c0_i32_0 : i32, i32
  }
  func.func @transform_1(%arg0: i32) -> (i32, i32) {
    %c0_i32 = arith.constant 0 : i32
    %c0_i32_0 = arith.constant 0 : i32
    %c0_i32_1 = arith.constant 0 : i32
    return %c0_i32, %c0_i32_0 : i32, i32
  }
  func.func @transform_2(%arg0: i32) -> (i32, i32) {
    %c0_i32 = arith.constant 0 : i32
    %c0_i32_0 = arith.constant 0 : i32
    %c0_i32_1 = arith.constant 0 : i32
    return %c0_i32, %c0_i32_0 : i32, i32
  }
  func.func @transform_3(%arg0: i32) -> (i32, i32) {
    %c0_i32 = arith.constant 0 : i32
    %c0_i32_0 = arith.constant 0 : i32
    return %arg0, %c0_i32 : i32, i32
  }
  func.func @transform_4(%arg0: i32) -> (i32, i32) {
    %c0_i32 = arith.constant 0 : i32
    %c0_i32_0 = arith.constant 0 : i32
    return %arg0, %c0_i32 : i32, i32
  }
  func.func @transform_5(%arg0: i32) -> (i32, i32, i32) {
    %c0_i32 = arith.constant 0 : i32
    %c0_i32_0 = arith.constant 0 : i32
    %c0_i32_1 = arith.constant 0 : i32
    return %arg0, %c0_i32, %c0_i32_0 : i32, i32, i32
  }
}

module attributes {stable_mosaic.version = 11 : i64} {
  func.func @_npairs_kernel(%arg0: i32, %arg1: memref<8x32xf32, #tpu.memory_space<vmem>>, %arg2: memref<1x8xi32, #tpu.memory_space<vmem>>, %arg3: memref<1x8xi32, #tpu.memory_space<vmem>>, %arg4: memref<8x1xi32, #tpu.memory_space<vmem>>, %arg5: memref<8x1xi32, #tpu.memory_space<vmem>>, %arg6: memref<1x8x128xf32, #tpu.memory_space<vmem>>) attributes {dimension_semantics = [#tpu.dimension_semantics<parallel>], iteration_bounds = array<i64: 1>, scalar_prefetch = 0 : i64, scratch_operands = 0 : i64, tpu.core_type = #tpu.core_type<tc>, window_params = [{pipeline_mode = #tpu.pipeline_mode<synchronous>, transform_indices = @transform_0, window_bounds = array<i64: 8, 32>}, {pipeline_mode = #tpu.pipeline_mode<synchronous>, transform_indices = @transform_1, window_bounds = array<i64: 1, 8>}, {pipeline_mode = #tpu.pipeline_mode<synchronous>, transform_indices = @transform_2, window_bounds = array<i64: 1, 8>}, {transform_indices = @transform_3, window_bounds = array<i64: 8, 1>}, {transform_indices = @transform_4, window_bounds = array<i64: 8, 1>}, {transform_indices = @transform_5, window_bounds = array<i64: 1, 8, 128>}]} {
    %c8_i32 = arith.constant 8 : i32
    %0 = arith.muli %arg0, %c8_i32 : i32
    %1 = tpu.assume_multiple %0, 8 : i32
    %2 = arith.index_cast %1 : i32 to index
    %c0 = arith.constant 0 : index
    %3 = vector.load %arg1[%2, %c0] : memref<8x32xf32, #tpu.memory_space<vmem>>, vector<8x32xf32>
    %c0_0 = arith.constant 0 : index
    %c0_1 = arith.constant 0 : index
    %4 = vector.load %arg1[%c0_0, %c0_1] : memref<8x32xf32, #tpu.memory_space<vmem>>, vector<8x32xf32>
    %cst = arith.constant dense<0.000000e+00> : vector<8x8xf32>
    %5 = tpu.matmul %3, %4, %cst {dimension_numbers = #tpu.dot_dimension_numbers<[1], [1], [0], [0], [0, 0, 1, 0], [], []>} : vector<8x32xf32>, vector<8x32xf32>, vector<8x8xf32> -> vector<8x8xf32>
    %c0_2 = arith.constant 0 : index
    %c0_3 = arith.constant 0 : index
    %6 = vector.load %arg2[%c0_2, %c0_3] : memref<1x8xi32, #tpu.memory_space<vmem>>, vector<1x8xi32>
    %c0_4 = arith.constant 0 : index
    %c0_5 = arith.constant 0 : index
    %7 = vector.load %arg3[%c0_4, %c0_5] : memref<1x8xi32, #tpu.memory_space<vmem>>, vector<1x8xi32>
    %c0_6 = arith.constant 0 : index
    %c0_7 = arith.constant 0 : index
    %8 = vector.load %arg4[%c0_6, %c0_7] : memref<8x1xi32, #tpu.memory_space<vmem>>, vector<8x1xi32>
    %c0_8 = arith.constant 0 : index
    %c0_9 = arith.constant 0 : index
    %9 = vector.load %arg5[%c0_8, %c0_9] : memref<8x1xi32, #tpu.memory_space<vmem>>, vector<8x1xi32>
    %10 = vector.broadcast %8 : vector<8x1xi32> to vector<8x8xi32>
    %11 = vector.broadcast %6 : vector<1x8xi32> to vector<8x8xi32>
    %12 = arith.cmpi eq, %10, %11 : vector<8x8xi32>
    %13 = vector.broadcast %9 : vector<8x1xi32> to vector<8x8xi32>
    %14 = vector.broadcast %7 : vector<1x8xi32> to vector<8x8xi32>
    %15 = arith.cmpi eq, %13, %14 : vector<8x8xi32>
    %16 = arith.andi %12, %15 : vector<8x8xi1>
    %17 = arith.ori %12, %15 : vector<8x8xi1>
    %cst_10 = arith.constant -1.000000e+30 : f32
    %18 = vector.broadcast %cst_10 : f32 to vector<8x8xf32>
    %19 = arith.select %16, %18, %5 : vector<8x8xi1>, vector<8x8xf32>
    %cst_11 = arith.constant dense<0xFF800000> : vector<8xf32>
    %20 = vector.multi_reduction <maximumf>, %19, %cst_11 [1] : vector<8x8xf32> to vector<8xf32>
    %21 = vector.shape_cast %20 : vector<8xf32> to vector<8x1xf32>
    %cst_12 = arith.constant -9.99999986E+14 : f32
    %22 = vector.broadcast %cst_12 : f32 to vector<8x1xf32>
    %23 = arith.maximumf %21, %22 : vector<8x1xf32>
    %24 = vector.broadcast %23 : vector<8x1xf32> to vector<8x8xf32>
    %25 = arith.subf %5, %24 : vector<8x8xf32>
    %26 = math.exp %25 : vector<8x8xf32>
    %cst_13 = arith.constant 0.000000e+00 : f32
    %27 = vector.broadcast %cst_13 : f32 to vector<8x8xf32>
    %28 = arith.select %16, %27, %26 : vector<8x8xi1>, vector<8x8xf32>
    %cst_14 = arith.constant dense<0.000000e+00> : vector<8xf32>
    %29 = vector.multi_reduction <add>, %28, %cst_14 [1] : vector<8x8xf32> to vector<8xf32>
    %30 = vector.shape_cast %29 : vector<8xf32> to vector<8x1xf32>
    %cst_15 = arith.constant 0.000000e+00 : f32
    %31 = vector.broadcast %cst_15 : f32 to vector<8x8xf32>
    %32 = arith.select %17, %31, %26 : vector<8x8xi1>, vector<8x8xf32>
    %cst_16 = arith.constant dense<0.000000e+00> : vector<8xf32>
    %33 = vector.multi_reduction <add>, %32, %cst_16 [1] : vector<8x8xf32> to vector<8xf32>
    %34 = vector.shape_cast %33 : vector<8xf32> to vector<8x1xf32>
    %35 = math.log %30 : vector<8x1xf32>
    %36 = arith.addf %23, %35 : vector<8x1xf32>
    %37 = math.log %34 : vector<8x1xf32>
    %38 = arith.addf %23, %37 : vector<8x1xf32>
    %39 = vector.shape_cast %36 : vector<8x1xf32> to vector<8x1xf32>
    %40 = vector.broadcast %39 : vector<8x1xf32> to vector<8x8xf32>
    %41 = vector.shape_cast %38 : vector<8x1xf32> to vector<8x1xf32>
    %42 = vector.broadcast %41 : vector<8x1xf32> to vector<8x8xf32>
    %43 = arith.select %16, %40, %42 : vector<8x8xi1>, vector<8x8xf32>
    %44 = arith.subf %43, %5 : vector<8x8xf32>
    %cst_17 = arith.constant 0.000000e+00 : f32
    %45 = vector.broadcast %cst_17 : f32 to vector<8x8xf32>
    %46 = arith.maximumf %44, %45 : vector<8x8xf32>
    %47 = math.absf %44 : vector<8x8xf32>
    %cst_18 = arith.constant 0.000000e+00 : f32
    %48 = vector.broadcast %cst_18 : f32 to vector<8x8xf32>
    %49 = arith.subf %48, %47 : vector<8x8xf32>
    %50 = math.exp %49 : vector<8x8xf32>
    %51 = math.log1p %50 : vector<8x8xf32>
    %52 = arith.addf %46, %51 : vector<8x8xf32>
    %cst_19 = arith.constant 0.000000e+00 : f32
    %53 = vector.broadcast %cst_19 : f32 to vector<8x8xf32>
    %54 = arith.select %17, %52, %53 : vector<8x8xi1>, vector<8x8xf32>
    %cst_20 = arith.constant dense<0.000000e+00> : vector<8xf32>
    %55 = vector.multi_reduction <add>, %54, %cst_20 [1] : vector<8x8xf32> to vector<8xf32>
    %56 = vector.shape_cast %55 : vector<8xf32> to vector<8x1xf32>
    %57 = vector.shape_cast %56 : vector<8x1xf32> to vector<1x8x1xf32>
    %cst_21 = arith.constant dense<0.000000e+00> : vector<1xf32>
    %58 = vector.multi_reduction <add>, %57, %cst_21 [1, 2] : vector<1x8x1xf32> to vector<1xf32>
    %59 = vector.shape_cast %58 : vector<1xf32> to vector<1x1x1xf32>
    %60 = vector.extract %59[0, 0, 0] : f32 from vector<1x1x1xf32>
    %61 = vector.broadcast %60 : f32 to vector<1x8x128xf32>
    %c0_22 = arith.constant 0 : index
    %c0_23 = arith.constant 0 : index
    %c0_24 = arith.constant 0 : index
    %62 = vector.load %arg6[%c0_22, %c0_23, %c0_24] : memref<1x8x128xf32, #tpu.memory_space<vmem>>, vector<1x8x128xf32>
    tpu.vector_store %arg6[%c0_22, %c0_23, %c0_24], %61 {strides = array<i32>} : memref<1x8x128xf32, #tpu.memory_space<vmem>>, vector<1x8x128xf32>,
    return
  }
  func.func @transform_0(%arg0: i32) -> (i32, i32) {
    %c0_i32 = arith.constant 0 : i32
    %c0_i32_0 = arith.constant 0 : i32
    %c0_i32_1 = arith.constant 0 : i32
    return %c0_i32, %c0_i32_0 : i32, i32
  }
  func.func @transform_1(%arg0: i32) -> (i32, i32) {
    %c0_i32 = arith.constant 0 : i32
    %c0_i32_0 = arith.constant 0 : i32
    %c0_i32_1 = arith.constant 0 : i32
    return %c0_i32, %c0_i32_0 : i32, i32
  }
  func.func @transform_2(%arg0: i32) -> (i32, i32) {
    %c0_i32 = arith.constant 0 : i32
    %c0_i32_0 = arith.constant 0 : i32
    %c0_i32_1 = arith.constant 0 : i32
    return %c0_i32, %c0_i32_0 : i32, i32
  }
  func.func @transform_3(%arg0: i32) -> (i32, i32) {
    %c0_i32 = arith.constant 0 : i32
    %c0_i32_0 = arith.constant 0 : i32
    return %arg0, %c0_i32 : i32, i32
  }
  func.func @transform_4(%arg0: i32) -> (i32, i32) {
    %c0_i32 = arith.constant 0 : i32
    %c0_i32_0 = arith.constant 0 : i32
    return %arg0, %c0_i32 : i32, i32
  }
  func.func @transform_5(%arg0: i32) -> (i32, i32, i32) {
    %c0_i32 = arith.constant 0 : i32
    %c0_i32_0 = arith.constant 0 : i32
    %c0_i32_1 = arith.constant 0 : i32
    return %arg0, %c0_i32, %c0_i32_0 : i32, i32, i32
  }
}

</mosaic_0001>

<bundles_post_ra>
// kernel: tpu_custom_call.1
= control target key start
LH: loop header
LB: loop body
LE: loop exit
PB: predicated region body
PF: predicated region fallthrough
CT: control target
= control target key end

     0   :  { %vm25_vm0 = vcmask 261120   ;;  %v247_v2 = vmov 0.0   ;;  %vm248_vm1 = vmmov 0   ;;  %s330_s0 = inlined_call_operand.vmem [shape: f32[8,32], index: 0, kind: input, shape index: {}]   ;;  %s331_s1 = inlined_call_operand.vmem [shape: s32[1,8], index: 1, kind: input, shape index: {}]   ;;  %s332_s2 = inlined_call_operand.vmem [shape: s32[1,8], index: 2, kind: input, shape index: {}]   ;;  %s333_s3 = inlined_call_operand.vmem [shape: s32[8,1], index: 3, kind: input, shape index: {}]   ;;  %s334_s4 = inlined_call_operand.vmem [shape: s32[8,1], index: 4, kind: input, shape index: {}]   ;;  %s335_s5 = inlined_call_operand.hbm [shape: f32[1,8,128], index: 5, kind: output, shape index: {}]  }
   0x1   :  { %v24_v0 = vld [vmem:[%s330_s0] sm:$0xff]  ;;  %201 = vmatprep.subr.mxu0 %v247_v2  ;;  %203 = vmatprep.mubr.msk.f32.mxu0 %vm248_vm1, %v247_v2 }
   0x2   :  { %v104_v1 = vld [vmem:[%s333_s3] sm:$0xff] }
   0x3   :  { %10 = vsyncpa [#allocation3], 0  ;;  %202 = vmatpush3.xpose.msk.msra.mxu0 %vm25_vm0, %v24_v0  ;;  %v249_v3 = vmov 0   ;;  %v105_v4 = vld [vmem:[%s334_s4] sm:$0xff]  ;;  %vm125_vm5 = vcmask 64512   ;;  %vm168_vm8 = vcmask 7168  }
   0x4   :  { %212 = vset.pattern.permute.xlu0 %v249_v3  ;;  %v197_v6 = vld [vmem:[%s331_s1] ss:$0 sm:$0xff]  ;;  %s250_s1 = smov [#allocation2]  }
   0x5   :  { %107 = vperm.xlu0 %212, %v104_v1   ;;  %v198_v7 = vld [vmem:[%s332_s2] ss:$0 sm:$0xff]  ;;  %s187_s2 = sshll.u32 %s250_s1, 4  ;;  %s188_s2 = int_to_ptr.vmem [resolvable:$true] %s187_s2 }
   0x6   :  { %204 = vmatmul.mubr.msk.f32.vlgmr.msra.gmra.mrb[0].mxu0 %vm25_vm0, %v24_v0  ;;  %s223_s26 = scalar_lea.vmem %s188_s2, 128  ;;  %p228_p1 = scmp.lt.s32.totalorder %s188_s2, %s188_s2 }
   0x7   :  { %p224_p0 = scmp.ne.s32.totalorder %s188_s2, %s223_s26  ;;  %p229_p2 = scmp.lt.s32.totalorder %s223_s26, %s223_s26 }
   0x9   :  { %115 = vperm.xlu0 %212, %v105_v4   ;;  %p230_p3 = por %p229_p2, %p228_p1 }
   0xb   :  { %p231_p4 = pnand %p230_p3, %p224_p0 }
  0x84   :  { %v108_v5 = vpop.permute.xlu0 %107 }
  0x85   :  { %vm113_vm2 = vcmp.eq.s32.totalorder %v108_v5, %v197_v6 }
  0x88   :  { %v116_v8 = vpop.permute.xlu0 %115 }
  0x89   :  { %vm121_vm3 = vcmp.eq.s32.totalorder %v116_v8, %v198_v7 }
  0x8a   :  { %vm296_vm4 = vmor %vm113_vm2, %vm121_vm3 }
  0x8b   :  { %vm300_vm6 = vmand %vm113_vm2, %vm121_vm3 }
  0xd9   :  { %v98_v11 = vpop.f32.mrb[0].mxu0 }
  0xda   :  { %v205_v12 = vpop.f32.mrb[1].mxu0  ;;  %v124_v13 = vsel %vm300_vm6, -1e+30, %v98_v11 }
  0xdb   :  { %v126_v14 = vsel %vm125_vm5, %v124_v13, -inf }
  0xdc   :  { %127 = vmax.xlane.f32.xlu1 %v126_v14 }
 0x169   :  { %v128_v15 = vpop.xlane.xlu1 %127 }
 0x16a   :  { %v129_v16 = vmax.f32 %v128_v15, -1e+15 }
 0x16c   :  { %v130_v17 = vsub.f32 %v98_v11, %v129_v16 }
 0x16e   :  { %v131_v18 = vmul.f32 1.442695, %v130_v17 }
 0x170   :  { %213 = vpow2.f32 %v131_v18 }
 0x17a   :  { %v214_v19 = vpop.eup %213 }
 0x17b   :  { %v137_v20 = vsel %vm296_vm4, 0.0, %v214_v19  ;;  %v133_v21 = vsel %vm300_vm6, 0.0, %v214_v19 }
 0x17c   :  { %v138_v22 = vsel %vm125_vm5, %v137_v20, 0.0  ;;  %v134_v23 = vsel %vm125_vm5, %v133_v21, 0.0 }
 0x17d   :  { %139 = vadd.xlane.f32.xlu0 %v138_v22  ;;  %135 = vadd.xlane.f32.xlu1 %v134_v23 }
 0x20a   :  { %v140_v24 = vpop.xlane.xlu0 %139  ;;  %v136_v25 = vpop.xlane.xlu1 %135 }
 0x20b   :  { %215 = vlog2.f32 %v140_v24 }
 0x20c   :  { %217 = vlog2.f32 %v136_v25 }
 0x215   :  { %v216_v26 = vpop.eup %215 }
 0x216   :  { %v218_v27 = vpop.eup %217  ;;  %v145_v28 = vmul.f32 0.6931472, %v216_v26 }
 0x217   :  { %v142_v29 = vmul.f32 0.6931472, %v218_v27 }
 0x218   :  { %v146_v30 = vadd.f32 %v145_v28, %v129_v16 }
 0x219   :  { %v143_v31 = vadd.f32 %v142_v29, %v129_v16 }
 0x21b   :  { %v147_v32 = vsel %vm300_vm6, %v143_v31, %v146_v30 }
 0x21c   :  { %v148_v33 = vsub.f32 %v147_v32, %v98_v11 }
 0x21e   :  { %v150_v34 = vand.u32 2147483647, %v148_v33  ;;  %v149_v45 = vmax.f32 %v148_v33, 0.0 }
 0x220   :  { %v151_v35 = vsub.f32 0.0, %v150_v34 }
 0x222   :  { %v152_v36 = vmul.f32 1.442695, %v151_v35 }
 0x224   :  { %219 = vpow2.f32 %v152_v36 }
 0x22e   :  { %v220_v37 = vpop.eup %219 }
 0x22f   :  { %v154_v38 = vadd.f32 1.0, %v220_v37  ;;  %v157_v39 = vmul.f32 -0.5, %v220_v37  ;;  %v160_v41 = vand.u32 2147483647, %v220_v37 }
 0x231   :  { %221 = vlog2.f32 %v154_v38  ;;  %v158_v40 = vadd.f32 1.0, %v157_v39  ;;  %vm161_vm7 = vcmp.lt.f32.partialorder %v160_v41, 0.0004427343 }
 0x233   :  { %v159_v44 = vmul.f32 %v220_v37, %v158_v40 }
 0x23b   :  { %v222_v42 = vpop.eup %221 }
 0x23c   :  { %v156_v43 = vmul.f32 0.6931472, %v222_v42 }
 0x23e   :  { %v162_v46 = vsel %vm161_vm7, %v159_v44, %v156_v43 }
 0x23f   :  { %v163_v47 = vadd.f32 %v162_v46, %v149_v45 }
 0x241   :  { %v164_v48 = vsel %vm296_vm4, %v163_v47, 0.0 }
 0x242   :  { %v165_v49 = vsel %vm125_vm5, %v164_v48, 0.0 }
 0x243   :  { %166 = vadd.xlane.f32.xlu1 %v165_v49 }
 0x2d0   :  { %v167_v50 = vpop.xlane.xlu1 %166 }
 0x2d1   :  { %v169_v51 = vsel %vm168_vm8, %v167_v50, 0.0 }
 0x2d2   :  { %170 = vadd.xlane.f32.xlu1 %v169_v51 }
 0x35f   :  { %v171_v52 = vpop.xlane.xlu1 %170 }
 0x360   :  { %v172_v53 = vrot.slane %v171_v52, 4 }
 0x362   :  { %v173_v54 = vadd.f32 %v172_v53, %v171_v52 }
 0x364   :  { %v174_v55 = vrot.slane %v173_v54, 2 }
 0x366   :  { %v175_v56 = vadd.f32 %v174_v55, %v173_v54 }
 0x368   :  { %v176_v57 = vrot.slane %v175_v56, 1 }
 0x36a   :  { %v177_v58 = vadd.f32 %v176_v57, %v175_v56 }
 0x36c   :  { %206 = vpush %v177_v58 }
 0x39d   :  { %s207_s4 = spop %206 }
 0x39e   :  { %v179_v59 = vstv %s207_s4 }
 0x39f   :  { %180 = vst [vmem:[#allocation2] sm:$0xff] %v179_v59 }
 0x3a0   :  { %234 = shalt.err (!%p231_p4)
}
 0x3a1   :  { %s235_s29 = scalar_lea.hbm %s335_s5, 128 }
 0x3a2   :  { %p236_p5 = scmp.ne.s32.totalorder %s335_s5, %s235_s29  ;;  %p239_p6 = scmp.lt.u32.totalorder %s235_s29, %s335_s5 }
 0x3a4   :  { %p241_p7 = pnand %p239_p6, %p236_p5 }
 0x3a6   :  { %244 = shalt.err (!%p241_p7)
}
 0x3a7   :  { %190 = dma.vmem_to_hbm [thread:$0]  %s188_s2, 128, %s335_s5, [#allocation3]  }
 0x3a8   :  { %245 = dma.done.wait [#allocation3], 128  }
 0x3a9   :  { %246 = vsyncadd [#allocation3], 4294967168 }
 0x3aa   :  { %194 = vsyncpa [#allocation3], 1 }

// kernel: tpu_custom_call.1
= control target key start
LH: loop header
LB: loop body
LE: loop exit
PB: predicated region body
PF: predicated region fallthrough
CT: control target
= control target key end

     0   :  { %vm25_vm0 = vcmask 261120   ;;  %v247_v2 = vmov 0.0   ;;  %vm248_vm1 = vmmov 0   ;;  %s330_s0 = inlined_call_operand.vmem [shape: f32[8,32], index: 0, kind: input, shape index: {}]   ;;  %s331_s1 = inlined_call_operand.vmem [shape: s32[1,8], index: 1, kind: input, shape index: {}]   ;;  %s332_s2 = inlined_call_operand.vmem [shape: s32[1,8], index: 2, kind: input, shape index: {}]   ;;  %s333_s3 = inlined_call_operand.vmem [shape: s32[8,1], index: 3, kind: input, shape index: {}]   ;;  %s334_s4 = inlined_call_operand.vmem [shape: s32[8,1], index: 4, kind: input, shape index: {}]   ;;  %s335_s5 = inlined_call_operand.hbm [shape: f32[1,8,128], index: 5, kind: output, shape index: {}]  }
   0x1   :  { %v24_v0 = vld [vmem:[%s330_s0] sm:$0xff]  ;;  %201 = vmatprep.subr.mxu0 %v247_v2  ;;  %203 = vmatprep.mubr.msk.f32.mxu0 %vm248_vm1, %v247_v2 }
   0x2   :  { %v104_v1 = vld [vmem:[%s333_s3] sm:$0xff] }
   0x3   :  { %10 = vsyncpa [#allocation3], 0  ;;  %202 = vmatpush3.xpose.msk.msra.mxu0 %vm25_vm0, %v24_v0  ;;  %v249_v3 = vmov 0   ;;  %v105_v4 = vld [vmem:[%s334_s4] sm:$0xff]  ;;  %vm125_vm5 = vcmask 64512   ;;  %vm168_vm8 = vcmask 7168  }
   0x4   :  { %212 = vset.pattern.permute.xlu0 %v249_v3  ;;  %v197_v6 = vld [vmem:[%s331_s1] ss:$0 sm:$0xff]  ;;  %s250_s1 = smov [#allocation2]  }
   0x5   :  { %107 = vperm.xlu0 %212, %v104_v1   ;;  %v198_v7 = vld [vmem:[%s332_s2] ss:$0 sm:$0xff]  ;;  %s187_s2 = sshll.u32 %s250_s1, 4  ;;  %s188_s2 = int_to_ptr.vmem [resolvable:$true] %s187_s2 }
   0x6   :  { %204 = vmatmul.mubr.msk.f32.vlgmr.msra.gmra.mrb[0].mxu0 %vm25_vm0, %v24_v0  ;;  %s223_s26 = scalar_lea.vmem %s188_s2, 128  ;;  %p228_p1 = scmp.lt.s32.totalorder %s188_s2, %s188_s2 }
   0x7   :  { %p224_p0 = scmp.ne.s32.totalorder %s188_s2, %s223_s26  ;;  %p229_p2 = scmp.lt.s32.totalorder %s223_s26, %s223_s26 }
   0x9   :  { %115 = vperm.xlu0 %212, %v105_v4   ;;  %p230_p3 = por %p229_p2, %p228_p1 }
   0xb   :  { %p231_p4 = pnand %p230_p3, %p224_p0 }
  0x84   :  { %v108_v5 = vpop.permute.xlu0 %107 }
  0x85   :  { %vm113_vm2 = vcmp.eq.s32.totalorder %v108_v5, %v197_v6 }
  0x88   :  { %v116_v8 = vpop.permute.xlu0 %115 }
  0x89   :  { %vm121_vm3 = vcmp.eq.s32.totalorder %v116_v8, %v198_v7 }
  0x8a   :  { %vm296_vm4 = vmor %vm113_vm2, %vm121_vm3 }
  0x8b   :  { %vm300_vm6 = vmand %vm113_vm2, %vm121_vm3 }
  0xd9   :  { %v98_v11 = vpop.f32.mrb[0].mxu0 }
  0xda   :  { %v205_v12 = vpop.f32.mrb[1].mxu0  ;;  %v124_v13 = vsel %vm300_vm6, -1e+30, %v98_v11 }
  0xdb   :  { %v126_v14 = vsel %vm125_vm5, %v124_v13, -inf }
  0xdc   :  { %127 = vmax.xlane.f32.xlu1 %v126_v14 }
 0x169   :  { %v128_v15 = vpop.xlane.xlu1 %127 }
 0x16a   :  { %v129_v16 = vmax.f32 %v128_v15, -1e+15 }
 0x16c   :  { %v130_v17 = vsub.f32 %v98_v11, %v129_v16 }
 0x16e   :  { %v131_v18 = vmul.f32 1.442695, %v130_v17 }
 0x170   :  { %213 = vpow2.f32 %v131_v18 }
 0x17a   :  { %v214_v19 = vpop.eup %213 }
 0x17b   :  { %v137_v20 = vsel %vm296_vm4, 0.0, %v214_v19  ;;  %v133_v21 = vsel %vm300_vm6, 0.0, %v214_v19 }
 0x17c   :  { %v138_v22 = vsel %vm125_vm5, %v137_v20, 0.0  ;;  %v134_v23 = vsel %vm125_vm5, %v133_v21, 0.0 }
 0x17d   :  { %139 = vadd.xlane.f32.xlu0 %v138_v22  ;;  %135 = vadd.xlane.f32.xlu1 %v134_v23 }
 0x20a   :  { %v140_v24 = vpop.xlane.xlu0 %139  ;;  %v136_v25 = vpop.xlane.xlu1 %135 }
 0x20b   :  { %215 = vlog2.f32 %v140_v24 }
 0x20c   :  { %217 = vlog2.f32 %v136_v25 }
 0x215   :  { %v216_v26 = vpop.eup %215 }
 0x216   :  { %v218_v27 = vpop.eup %217  ;;  %v145_v28 = vmul.f32 0.6931472, %v216_v26 }
 0x217   :  { %v142_v29 = vmul.f32 0.6931472, %v218_v27 }
 0x218   :  { %v146_v30 = vadd.f32 %v145_v28, %v129_v16 }
 0x219   :  { %v143_v31 = vadd.f32 %v142_v29, %v129_v16 }
 0x21b   :  { %v147_v32 = vsel %vm300_vm6, %v143_v31, %v146_v30 }
 0x21c   :  { %v148_v33 = vsub.f32 %v147_v32, %v98_v11 }
 0x21e   :  { %v150_v34 = vand.u32 2147483647, %v148_v33  ;;  %v149_v45 = vmax.f32 %v148_v33, 0.0 }
 0x220   :  { %v151_v35 = vsub.f32 0.0, %v150_v34 }
 0x222   :  { %v152_v36 = vmul.f32 1.442695, %v151_v35 }
 0x224   :  { %219 = vpow2.f32 %v152_v36 }
 0x22e   :  { %v220_v37 = vpop.eup %219 }
 0x22f   :  { %v154_v38 = vadd.f32 1.0, %v220_v37  ;;  %v157_v39 = vmul.f32 -0.5, %v220_v37  ;;  %v160_v41 = vand.u32 2147483647, %v220_v37 }
 0x231   :  { %221 = vlog2.f32 %v154_v38  ;;  %v158_v40 = vadd.f32 1.0, %v157_v39  ;;  %vm161_vm7 = vcmp.lt.f32.partialorder %v160_v41, 0.0004427343 }
 0x233   :  { %v159_v44 = vmul.f32 %v220_v37, %v158_v40 }
 0x23b   :  { %v222_v42 = vpop.eup %221 }
 0x23c   :  { %v156_v43 = vmul.f32 0.6931472, %v222_v42 }
 0x23e   :  { %v162_v46 = vsel %vm161_vm7, %v159_v44, %v156_v43 }
 0x23f   :  { %v163_v47 = vadd.f32 %v162_v46, %v149_v45 }
 0x241   :  { %v164_v48 = vsel %vm296_vm4, %v163_v47, 0.0 }
 0x242   :  { %v165_v49 = vsel %vm125_vm5, %v164_v48, 0.0 }
 0x243   :  { %166 = vadd.xlane.f32.xlu1 %v165_v49 }
 0x2d0   :  { %v167_v50 = vpop.xlane.xlu1 %166 }
 0x2d1   :  { %v169_v51 = vsel %vm168_vm8, %v167_v50, 0.0 }
 0x2d2   :  { %170 = vadd.xlane.f32.xlu1 %v169_v51 }
 0x35f   :  { %v171_v52 = vpop.xlane.xlu1 %170 }
 0x360   :  { %v172_v53 = vrot.slane %v171_v52, 4 }
 0x362   :  { %v173_v54 = vadd.f32 %v172_v53, %v171_v52 }
 0x364   :  { %v174_v55 = vrot.slane %v173_v54, 2 }
 0x366   :  { %v175_v56 = vadd.f32 %v174_v55, %v173_v54 }
 0x368   :  { %v176_v57 = vrot.slane %v175_v56, 1 }
 0x36a   :  { %v177_v58 = vadd.f32 %v176_v57, %v175_v56 }
 0x36c   :  { %206 = vpush %v177_v58 }
 0x39d   :  { %s207_s4 = spop %206 }
 0x39e   :  { %v179_v59 = vstv %s207_s4 }
 0x39f   :  { %180 = vst [vmem:[#allocation2] sm:$0xff] %v179_v59 }
 0x3a0   :  { %234 = shalt.err (!%p231_p4)
}
 0x3a1   :  { %s235_s29 = scalar_lea.hbm %s335_s5, 128 }
 0x3a2   :  { %p236_p5 = scmp.ne.s32.totalorder %s335_s5, %s235_s29  ;;  %p239_p6 = scmp.lt.u32.totalorder %s235_s29, %s335_s5 }
 0x3a4   :  { %p241_p7 = pnand %p239_p6, %p236_p5 }
 0x3a6   :  { %244 = shalt.err (!%p241_p7)
}
 0x3a7   :  { %190 = dma.vmem_to_hbm [thread:$0]  %s188_s2, 128, %s335_s5, [#allocation3]  }
 0x3a8   :  { %245 = dma.done.wait [#allocation3], 128  }
 0x3a9   :  { %246 = vsyncadd [#allocation3], 4294967168 }
 0x3aa   :  { %194 = vsyncpa [#allocation3], 1 }

</bundles_post_ra>
